<compile_context>
chip_gen: v5e
topology: v5e:2x2
jax: 0.10.0
libtpu: 0.0.40
codegen_flags: <defaults>
</compile_context>

<pallas_src>
import jax
import jax.numpy as jnp
from jax.experimental import pallas as pl
from jax.experimental.pallas import tpu as pltpu


_LANE_CANDIDATES = (1024, 512, 256, 128)  # last dim of the flattened slab
_BYPASS_ELEMS = 1 << 18   # below this, a fused XLA elementwise op wins (launch cost)


def _round_up(x, m):
    return ((x + m - 1) // m) * m


def _chip_config():
    """Return (max_tile_elems, num_tensorcores) for the local TPU generation.

    Tile caps keep the double-buffered block footprint (int8 in + f32 out,
    ~5 B/elem * 2 buffers) inside each generation's *default* scoped-VMEM:
      v5e : 16 MiB default ->  8192*128 elems (~10 MiB double-buffered)
      v6e : 32 MiB default -> 16384*128 elems (~20 MiB double-buffered)
      v7x : 32 MiB default -> 16384*128 elems, 2 TensorCores to shard across.
    Unknown chips fall back to the conservative v5e-safe cap.
    """
    max_rows_128, n_tc = 8192, 1
    try:
        kind = jax.devices()[0].device_kind.lower()
        if "v7" in kind or "7x" in kind:
            max_rows_128, n_tc = 16384, 2
        elif "v6" in kind:
            max_rows_128, n_tc = 16384, 1
    except Exception:
        pass
    return max_rows_128 * 128, n_tc


def _dequant_kernel(params_ref, xq_ref, out_ref):
    # params_ref lives in SMEM: [scale, zero_point] as f32 scalars.
    scale = params_ref[0]
    zp = params_ref[1]
    q = xq_ref[...].astype(jnp.float32)
    # (q - zp) * scale: same op order as PyTorch's dequantize (one rounding).
    out_ref[...] = ((q - zp) * scale).astype(out_ref.dtype)


def dequantize(xq, scale, zero_point, out_dtype=jnp.float32, force_pallas=False):
    """Dequantize a per-tensor-affine int8 array: (xq - zero_point) * scale.

    xq:         int8 array, any shape (e.g. NCHW).
    scale:      python float or scalar jax array (per-tensor scale).
    zero_point: python int   or scalar jax array (per-tensor zero point).
    out_dtype:  float32 by default (torch DeQuantize semantics); bf16 cuts HBM
                traffic from 5 to 3 B/elem if the consumer tolerates it.
    """
    orig_shape = xq.shape
    total = int(xq.size)

    scale_f = jnp.asarray(scale, jnp.float32).reshape(())
    zp_f = jnp.asarray(zero_point, jnp.float32).reshape(())

    def _xla_path():
        # Fused XLA elementwise already sits at the 5 B/elem HBM roofline.
        return ((xq.astype(jnp.float32) - zp_f) * scale_f).astype(out_dtype)

    if total == 0:
        return jnp.zeros(orig_shape, out_dtype)

    # Widest lane count that divides total -> zero-copy reshape, no padding.
    lanes = None
    for cand in _LANE_CANDIDATES:
        if total % cand == 0:
            lanes = cand
            break

    if lanes is None:
        # TODO(synk): ragged totals could keep a Pallas path via an exact-length
        # manual DMA (pl.ANY flat output + masked tail store); the fused XLA op
        # runs at the same HBM roofline, so fall back instead of paying
        # jnp.pad + output-slice extra HBM passes.
        return _xla_path()

    if total < _BYPASS_ELEMS and not force_pallas:
        return _xla_path()

    rows = total // lanes
    x2d = xq.reshape(rows, lanes)            # zero-copy for default layouts

    max_tile_elems, n_tc = _chip_config()
    cap_rows = max(max_tile_elems // lanes, 8)   # always a multiple of 8

    if rows <= cap_rows:
        if n_tc >= 2 and rows >= 16:
            # v7x: one tile per TensorCore so the 'parallel' axis keeps both
            # cores busy; tiles stay large and 8-row aligned.
            tile_rows = _round_up(-(-rows // n_tc), 8)
        else:
            # Single TC (v5e/v6e): one full-size step, no forced split.
            tile_rows = rows
    else:
        tile_rows = cap_rows
        if n_tc >= 2:
            # Balance: make the step count a multiple of the TC count so the
            # last step does not leave one core idle.
            steps = -(-rows // tile_rows)
            if steps % n_tc:
                steps = _round_up(steps, n_tc)
                tile_rows = _round_up(-(-rows // steps), 8)

    grid = (pl.cdiv(rows, tile_rows),)
    params = jnp.stack([scale_f, zp_f])      # (2,) f32 -> SMEM operand

    out2d = pl.pallas_call(
        _dequant_kernel,
        out_shape=jax.ShapeDtypeStruct((rows, lanes), out_dtype),
        grid=grid,
        in_specs=[
            pl.BlockSpec(memory_space=pltpu.MemorySpace.SMEM),
            pl.BlockSpec((tile_rows, lanes), lambda i: (i, 0)),
        ],
        out_specs=pl.BlockSpec((tile_rows, lanes), lambda i: (i, 0)),
        compiler_params=pltpu.CompilerParams(
            dimension_semantics=("parallel",)),
    )(params, x2d)

    return out2d.reshape(orig_shape)


if __name__ == "__main__":
    key0, key1 = jax.random.split(jax.random.PRNGKey(0))

    scale = 0.05
    zero_point = 2

    def quantize(x):
        # Emulates the Quantize module that would normally feed DeQuantize.
        return jnp.clip(jnp.round(x / scale) + zero_point, -128, 127).astype(jnp.int8)

    # --- Small NCHW shape consistent with the module (forces the Pallas path). ---
    N, C, H, W = 2, 4, 16, 16
    x_float = jax.random.normal(key0, (N, C, H, W), dtype=jnp.float32)
    q = quantize(x_float)

    x_deq = dequantize(q, scale, zero_point, force_pallas=True)
    x_deq = jax.block_until_ready(x_deq)

    ref = (q.astype(jnp.float32) - float(zero_point)) * float(scale)
    assert x_deq.shape == (N, C, H, W)
    assert x_deq.dtype == jnp.float32
    assert jnp.allclose(x_deq, ref, atol=1e-6, rtol=0.0)

    # --- Larger lane-aligned shape: exercises the wide-lane (1024) fast path
    #     and, on v7x, a balanced 2-step grid across both TensorCores. ---
    N2, C2, H2, W2 = 8, 16, 32, 32
    x2_float = jax.random.normal(key1, (N2, C2, H2, W2), dtype=jnp.float32)
    q2 = quantize(x2_float)

    d2 = jax.block_until_ready(dequantize(q2, scale, zero_point, force_pallas=True))
    ref2 = (q2.astype(jnp.float32) - float(zero_point)) * float(scale)
    assert d2.shape == (N2, C2, H2, W2)
    assert d2.dtype == jnp.float32
    assert jnp.allclose(d2, ref2, atol=1e-6, rtol=0.0)

    print("KERNEL_OK")
</pallas_src>

<mosaic_0001>
module attributes {stable_mosaic.version = 11 : i64} {
  func.func @_dequant_kernel(%arg0: i32, %arg1: memref<2xf32, #tpu.memory_space<smem>>, %arg2: memref<2x1024xi8, #tpu.memory_space<vmem>>, %arg3: memref<2x1024xf32, #tpu.memory_space<vmem>>) attributes {dimension_semantics = [#tpu.dimension_semantics<parallel>], iteration_bounds = array<i64: 1>, scalar_prefetch = 0 : i64, scratch_operands = 0 : i64, tpu.core_type = #tpu.core_type<tc>, window_params = [{transform_indices = @transform_0, window_bounds = array<i64: 2>}, {transform_indices = @transform_1, window_bounds = array<i64: 2, 1024>}, {transform_indices = @transform_2, window_bounds = array<i64: 2, 1024>}]} {
    %c0 = arith.constant 0 : index
    %0 = memref.load %arg1[%c0] : memref<2xf32, #tpu.memory_space<smem>>
    %c1 = arith.constant 1 : index
    %1 = memref.load %arg1[%c1] : memref<2xf32, #tpu.memory_space<smem>>
    %c0_0 = arith.constant 0 : index
    %c0_1 = arith.constant 0 : index
    %2 = vector.load %arg2[%c0_0, %c0_1] : memref<2x1024xi8, #tpu.memory_space<vmem>>, vector<2x1024xi8>
    %3 = arith.sitofp %2 : vector<2x1024xi8> to vector<2x1024xf32>
    %4 = vector.broadcast %1 : f32 to vector<2x1024xf32>
    %5 = arith.subf %3, %4 : vector<2x1024xf32>
    %6 = vector.broadcast %0 : f32 to vector<2x1024xf32>
    %7 = arith.mulf %5, %6 : vector<2x1024xf32>
    %c0_2 = arith.constant 0 : index
    %c0_3 = arith.constant 0 : index
    %8 = vector.load %arg3[%c0_2, %c0_3] : memref<2x1024xf32, #tpu.memory_space<vmem>>, vector<2x1024xf32>
    tpu.vector_store %arg3[%c0_2, %c0_3], %7 {strides = array<i32>} : memref<2x1024xf32, #tpu.memory_space<vmem>>, vector<2x1024xf32>,
    return
  }
  func.func @transform_0(%arg0: i32) -> i32 {
    %c0_i32 = arith.constant 0 : i32
    %c0_i32_0 = arith.constant 0 : i32
    return %c0_i32 : i32
  }
  func.func @transform_1(%arg0: i32) -> (i32, i32) {
    %c0_i32 = arith.constant 0 : i32
    %c0_i32_0 = arith.constant 0 : i32
    return %arg0, %c0_i32 : i32, i32
  }
  func.func @transform_2(%arg0: i32) -> (i32, i32) {
    %c0_i32 = arith.constant 0 : i32
    %c0_i32_0 = arith.constant 0 : i32
    return %arg0, %c0_i32 : i32, i32
  }
}

</mosaic_0001>

<bundles_post_ra>
// kernel: tpu_custom_call.1
= control target key start
LH: loop header
LB: loop body
LE: loop exit
PB: predicated region body
PF: predicated region fallthrough
CT: control target
= control target key end

     0   :  { %7 = vsyncpa [#allocation5], 0  ;;  %s200_s0 = inlined_call_operand.hbm [shape: f32[2], index: 0, kind: input, shape index: {}]   ;;  %s201_s1 = inlined_call_operand.hbm [shape: s8[2,1024], index: 1, kind: input, shape index: {}]   ;;  %s202_s2 = inlined_call_operand.hbm [shape: f32[2,1024], index: 2, kind: output, shape index: {}]  }
   0x1   :  { %8 = vsyncpa [#allocation3], 0 }
   0x2   :  { %9 = vsyncpa [#allocation4], 0  ;;  %s15_s11 = sshll.u32 %s200_s0, 4  ;;  %s24_s14 = sshll.u32 %s201_s1, 4  ;;  %s16_s11 = int_to_ptr.hbm [resolvable:$true] %s15_s11  ;;  %s25_s14 = int_to_ptr.hbm [resolvable:$true] %s24_s14 }
   0x3   :  { %s171_s15 = smov [#allocation2]   ;;  %s172_s16 = smov [#allocation6]  }
   0x4   :  { %18 = dma.hbm_to_smem %s16_s11, 16, %s171_s15, [#allocation5]  }
   0x5   :  { %s26_s17 = sshll.u32 %s172_s16, 4  ;;  %s27_s17 = int_to_ptr.vmem [resolvable:$true] %s26_s17 }
   0x6   :  { %29 = dma.hbm_to_vmem [thread:$0]  %s25_s14, 128, %s27_s17, [#allocation3]  }
   0x7   :  { %165 = dma.done.wait [#allocation5], 16  }
   0x8   :  { %166 = vsyncadd [#allocation5], 4294967280 }
   0x9   :  { %167 = dma.done.wait [#allocation3], 128  }
   0xa   :  { %168 = vsyncadd [#allocation3], 4294967168 }
   0xb   :  { %38 = sfence }
   0xc   :  { %s39_s18 = sld [smem:[#allocation2]]  ;;  %v41_v0 = vld [vmem:[#allocation6] sm:$0xff]  ;;  %vm70_vm0 = vcmask 1041408   ;;  %vm72_vm1 = vcmask 1045508   ;;  %vm74_vm2 = vcmask 1043456   ;;  %s173_s1 = smov [#allocation7]  }
   0xd   :  { %s101_s0 = sld [smem:[#allocation2 + $0x1]]  ;;  %v42_v1 = vunpack.c.0.s8 %v41_v0  ;;  %v43_v2 = vunpack.c.1.s8 %v41_v0  ;;  %v44_v3 = vunpack.c.2.s8 %v41_v0  ;;  %v45_v4 = vunpack.c.3.s8 %v41_v0  ;;  %s88_s19 = sshll.u32 %s173_s1, 4  ;;  %s89_s19 = int_to_ptr.vmem [resolvable:$true] %s88_s19 }
   0xe   :  { %s90_s22 = sshll.u32 %s202_s2, 4  ;;  %s91_s22 = int_to_ptr.hbm [resolvable:$true] %s90_s22 }
   0xf   :  { %v46_v5 = vcvt.s32.f32 %v42_v1  ;;  %v47_v6 = vcvt.s32.f32 %v43_v2  ;;  %v48_v7 = vcvt.s32.f32 %v44_v3  ;;  %v49_v8 = vcvt.s32.f32 %v45_v4 }
  0x12   :  { %v55_v10 = vstv %s39_s18 }
  0x13   :  { %v50_v9 = vstv %s101_s0 }
  0x14   :  { %v51_v11 = vsub.f32 %v46_v5, %v50_v9  ;;  %v52_v12 = vsub.f32 %v47_v6, %v50_v9  ;;  %v53_v13 = vsub.f32 %v48_v7, %v50_v9  ;;  %v54_v14 = vsub.f32 %v49_v8, %v50_v9 }
  0x16   :  { %v56_v15 = vmul.f32 %v55_v10, %v51_v11  ;;  %v57_v16 = vmul.f32 %v55_v10, %v52_v12  ;;  %v58_v17 = vmul.f32 %v55_v10, %v53_v13  ;;  %v59_v18 = vmul.f32 %v55_v10, %v54_v14 }
  0x18   :  { %v64_v19 = vrot.slane %v56_v15, 2  ;;  %v65_v20 = vrot.slane %v57_v16, 4  ;;  %v66_v21 = vrot.slane %v57_v16, 6  ;;  %v67_v22 = vrot.slane %v58_v17, 2 }
  0x19   :  { %v68_v23 = vrot.slane %v59_v18, 4  ;;  %v69_v24 = vrot.slane %v59_v18, 6 }
  0x1a   :  { %v71_v25 = vsel %vm70_vm0, %v56_v15, %v64_v19  ;;  %v73_v26 = vsel %vm72_vm1, %v65_v20, %v66_v21  ;;  %v76_v27 = vsel %vm70_vm0, %v58_v17, %v67_v22 }
  0x1b   :  { %v75_v28 = vsel %vm74_vm2, %v71_v25, %v73_v26  ;;  %v77_v29 = vsel %vm72_vm1, %v68_v23, %v69_v24 }
  0x1c   :  { %81 = vst [vmem:[#allocation7] sm:$0xff] %v75_v28  ;;  %v78_v30 = vsel %vm74_vm2, %v76_v27, %v77_v29 }
  0x1d   :  { %82 = vst [vmem:[#allocation7 + $0x8] sm:$0xff] %v78_v30 }
  0x1e   :  { %93 = dma.vmem_to_hbm [thread:$0]  %s89_s19, 256, %s91_s22, [#allocation4]  }
  0x1f   :  { %169 = dma.done.wait [#allocation4], 256  }
  0x20   :  { %170 = vsyncadd [#allocation4], 4294967040 }
  0x21   :  { %98 = vsyncpa [#allocation3], 1 }
  0x22   :  { %99 = vsyncpa [#allocation4], 1 }
  0x23   :  { %100 = vsyncpa [#allocation5], 1 }

</bundles_post_ra>
